<compile_context>
chip_gen: v7x
topology: tpu7x:2x2x1
jax: 0.10.0
libtpu: 0.0.40
codegen_flags: <defaults>
</compile_context>

<pallas_src>
import jax
import jax.numpy as jnp
from jax.experimental import pallas as pl
from jax.experimental.pallas import tpu as pltpu


def _round_up(x, m):
    return ((x + m - 1) // m) * m


# ---------------------------------------------------------------------------
# Kernel
# ---------------------------------------------------------------------------
def encoder_kernel(x_ref, w1_ref, b1_ref, wh_ref, bh_ref, out_ref):
    # fc1 + ReLU: bf16 x bf16 matmul on the MXU, f32 accumulate; bias/ReLU in f32 on VPU.
    h = jnp.dot(x_ref[...], w1_ref[...], preferred_element_type=jnp.float32) + b1_ref[...]
    h = jnp.maximum(h, 0.0)

    # Fused mean|log_var head: one matmul over a lane-dense (multiple-of-128) N.
    # TODO(synk): for very large hidden_dim, chunk this matmul over hidden-dim
    # slices (fori_loop, unroll=True) so the full f32 h + bf16 cast aren't live at once.
    h = h.astype(wh_ref.dtype)
    out = jnp.dot(h, wh_ref[...], preferred_element_type=jnp.float32) + bh_ref[...]
    out_ref[...] = out.astype(out_ref.dtype)


# ---------------------------------------------------------------------------
# One-time parameter preparation (hoisted out of the per-call hot path)
# ---------------------------------------------------------------------------
def prepare_encoder_params(w1, b1, wm, bm, wv, bv, *,
                           compute_dtype=jnp.bfloat16, hidden_align=128):
    """Fuse the two latent heads, pad to TPU-friendly shapes, cast to bf16.

    w1: (input_dim, hidden_dim); b1: (1, hidden_dim)
    wm/wv: (hidden_dim, latent_dim); bm/bv: (1, latent_dim)
    Returns (w1p, b1p, whp, bhp).  Run once; reuse across forward calls.
    """
    input_dim, hidden_dim = w1.shape
    latent_dim = wm.shape[1]

    # Pad hidden_dim to a lane/MXU-aligned width (padded columns are exactly zero:
    # 0-weight + 0-bias -> relu(0)=0 -> zero rows in the head weights contribute 0).
    hidden_pad = max(_round_up(hidden_dim, hidden_align), hidden_align)
    if hidden_pad != hidden_dim:
        dh = hidden_pad - hidden_dim
        w1 = jnp.pad(w1, ((0, 0), (0, dh)))
        b1 = jnp.pad(b1, ((0, 0), (0, dh)))
        wm = jnp.pad(wm, ((0, dh), (0, 0)))
        wv = jnp.pad(wv, ((0, dh), (0, 0)))

    # Fuse mean|log_var heads and pad the output (lane) axis to a multiple of 128.
    w_heads = jnp.concatenate([wm, wv], axis=1)           # (hidden_pad, 2*latent)
    b_heads = jnp.concatenate([bm, bv], axis=1)           # (1, 2*latent)
    n_out = 2 * latent_dim
    n_pad = max(_round_up(n_out, 128), 128)
    if n_pad != n_out:
        w_heads = jnp.pad(w_heads, ((0, 0), (0, n_pad - n_out)))
        b_heads = jnp.pad(b_heads, ((0, 0), (0, n_pad - n_out)))

    # dtype policy: bf16 matmul operands (f32 MXU accumulate), f32 biases.
    w1p = w1.astype(compute_dtype)
    whp = w_heads.astype(compute_dtype)
    b1p = b1.astype(jnp.float32)
    bhp = b_heads.astype(jnp.float32)
    return w1p, b1p, whp, bhp


# ---------------------------------------------------------------------------
# Batch-tile selection
# ---------------------------------------------------------------------------
def _tile_vmem_bytes(bb, input_dim, hidden_pad, n_pad):
    x_b = 2 * bb * input_dim * 2        # bf16 x tile, double-buffered
    out_b = 2 * bb * n_pad * 4          # f32 fused output tile, double-buffered
    tmp_b = bb * hidden_pad * (4 + 2)   # f32 hidden + its bf16 cast
    return x_b + out_b + tmp_b


def _pick_block_b(B, input_dim, hidden_pad, n_pad, *, tile_budget_bytes=20 << 20):
    """Batch tile: big (MXU M ~512 sweet spot) but never a 1-step grid, VMEM-capped."""
    bb = 512
    if B >= 64:
        bb = min(bb, max(16, _round_up(B, 8) // 4))   # >= 4 grid steps
    elif B >= 16:
        bb = min(bb, max(8, _round_up(B, 8) // 2))    # >= 2 grid steps
    else:
        bb = min(bb, _round_up(B, 8))                 # tiny batch: one 8-row tile
    bb = max(8, (bb // 8) * 8)
    if bb >= 32:                                      # prefer 16-aligned (bf16 sublanes)
        bb = (bb // 16) * 16
    # Shrink until the per-tile VMEM footprint fits the (v7x-safe) budget.
    while bb > 8 and _tile_vmem_bytes(bb, input_dim, hidden_pad, n_pad) > tile_budget_bytes:
        bb = max(8, ((bb // 2) // 8) * 8)
    return bb


# ---------------------------------------------------------------------------
# Forward pass
# ---------------------------------------------------------------------------
def encoder_forward(x, w1p, b1p, whp, bhp, latent_dim, *, block_b=None,
                    compute_dtype=jnp.bfloat16, tile_budget_bytes=20 << 20):
    """x: (B, input_dim) f32.  Prepared params from `prepare_encoder_params`.

    Returns (mean, log_var), each (B, latent_dim) float32.
    """
    B, input_dim = x.shape
    assert w1p.shape[0] == input_dim, "x feature dim must match prepared W1"
    hidden_pad = w1p.shape[1]
    n_pad = whp.shape[1]

    if block_b is None:
        block_b = _pick_block_b(B, input_dim, hidden_pad, n_pad,
                                tile_budget_bytes=tile_budget_bytes)
    else:
        assert block_b % 8 == 0, "block_b must be a multiple of 8 (sublane alignment)"

    # cdiv grid: pad the batch to a multiple of block_b (no giant single tile for odd B).
    B_pad = _round_up(B, block_b)
    xc = x.astype(compute_dtype)
    if B_pad != B:
        xc = jnp.pad(xc, ((0, B_pad - B), (0, 0)))
    grid = (B_pad // block_b,)

    # Grid-invariant weights/biases: constant index_map, single-buffered (loaded once).
    # NOTE: for very large input_dim/hidden_dim add a K grid axis to bound weight VMEM.
    def full(shape):
        return pl.BlockSpec(shape, lambda i: (0, 0), pipeline_mode=pl.Buffered(1))

    # VMEM limit: single-buffered weights + pipelined tiles, with headroom; v7x-safe cap.
    weight_bytes = (w1p.size * w1p.dtype.itemsize + whp.size * whp.dtype.itemsize
                    + b1p.size * 4 + bhp.size * 4)
    est_vmem = weight_bytes + _tile_vmem_bytes(block_b, input_dim, hidden_pad, n_pad)
    vmem_limit = int(min(60 << 20, max(32 << 20, int(est_vmem * 1.5) + (4 << 20))))

    flops = 2 * B_pad * (input_dim * hidden_pad + hidden_pad * n_pad)
    bytes_accessed = (B_pad * input_dim * 2) + weight_bytes + (B_pad * n_pad * 4)

    fused = pl.pallas_call(
        encoder_kernel,
        out_shape=jax.ShapeDtypeStruct((B_pad, n_pad), jnp.float32),
        grid_spec=pltpu.PrefetchScalarGridSpec(
            num_scalar_prefetch=0,
            grid=grid,
            in_specs=[
                pl.BlockSpec((block_b, input_dim), lambda i: (i, 0)),  # x tile (pipelined)
                full((input_dim, hidden_pad)),                         # W1
                full((1, hidden_pad)),                                 # b1
                full((hidden_pad, n_pad)),                             # Wm|Wv (fused, padded)
                full((1, n_pad)),                                      # bm|bv (fused, padded)
            ],
            out_specs=pl.BlockSpec((block_b, n_pad), lambda i: (i, 0)),  # mean|log_var
        ),
        compiler_params=pltpu.CompilerParams(
            # TODO(synk): on v7x, verify the batch grid shards across both TensorCores;
            # if not, switch to pltpu.CORE_PARALLEL on this axis.
            dimension_semantics=("parallel",),
            vmem_limit_bytes=vmem_limit,
        ),
        cost_estimate=pl.CostEstimate(flops=flops, transcendentals=0,
                                      bytes_accessed=bytes_accessed),
    )(xc, w1p, b1p, whp, bhp)

    mean = fused[:B, :latent_dim]
    log_var = fused[:B, latent_dim:2 * latent_dim]
    return mean, log_var


# ---------------------------------------------------------------------------
# Synthetic params + pure-JAX reference
# ---------------------------------------------------------------------------
def init_params(key, input_dim, hidden_dim, latent_dim):
    """Deterministic synthetic params matching nn.Linear shapes, pre-transposed."""
    k1, k2, k3, k4, k5, k6 = jax.random.split(key, 6)
    w1 = jax.random.normal(k1, (input_dim, hidden_dim), jnp.float32) * 0.1
    b1 = jax.random.normal(k2, (1, hidden_dim), jnp.float32) * 0.1
    wm = jax.random.normal(k3, (hidden_dim, latent_dim), jnp.float32) * 0.1
    bm = jax.random.normal(k4, (1, latent_dim), jnp.float32) * 0.1
    wv = jax.random.normal(k5, (hidden_dim, latent_dim), jnp.float32) * 0.1
    bv = jax.random.normal(k6, (1, latent_dim), jnp.float32) * 0.1
    return w1, b1, wm, bm, wv, bv


def reference_forward(x, w1, b1, wm, bm, wv, bv, compute_dtype=jnp.bfloat16):
    """Pure-JAX reference mirroring the kernel's bf16-operand / f32-accumulate math."""
    cast = lambda a: a.astype(compute_dtype).astype(jnp.float32)
    h = jnp.maximum(cast(x) @ cast(w1) + b1, 0.0)
    hc = cast(h)
    return hc @ cast(wm) + bm, hc @ cast(wv) + bv


if __name__ == "__main__":
    B, input_dim, hidden_dim, latent_dim = 16, 32, 64, 16
    key = jax.random.PRNGKey(0)
    kx, kp = jax.random.split(key)
    x = jax.random.normal(kx, (B, input_dim), jnp.float32)
    raw_params = init_params(kp, input_dim, hidden_dim, latent_dim)

    # One-time weight prep (head fusion, padding, bf16 cast) outside the hot path.
    w1p, b1p, whp, bhp = prepare_encoder_params(*raw_params)
    jax.block_until_ready((w1p, b1p, whp, bhp))

    # block_b=8 -> grid of 2 steps: exercises pipelining / dual-TC sharding.
    mean, log_var = encoder_forward(x, w1p, b1p, whp, bhp, latent_dim, block_b=8)
    jax.block_until_ready((mean, log_var))

    # Correctness check against a pure-JAX reference with matching dtype policy.
    ref_mean, ref_logvar = reference_forward(x, *raw_params)
    assert mean.shape == (B, latent_dim) and log_var.shape == (B, latent_dim)
    assert jnp.allclose(mean, ref_mean, atol=2e-3, rtol=2e-3)
    assert jnp.allclose(log_var, ref_logvar, atol=2e-3, rtol=2e-3)

    # Also exercise the auto-tiling path (non-divisible batch -> cdiv grid + pad).
    x2 = jax.random.normal(kx, (B + 3, input_dim), jnp.float32)
    m2, lv2 = encoder_forward(x2, w1p, b1p, whp, bhp, latent_dim)
    jax.block_until_ready((m2, lv2))
    rm2, rlv2 = reference_forward(x2, *raw_params)
    assert jnp.allclose(m2, rm2, atol=2e-3, rtol=2e-3)
    assert jnp.allclose(lv2, rlv2, atol=2e-3, rtol=2e-3)

    print("KERNEL_OK")
</pallas_src>

<mosaic_0001>
module attributes {stable_mosaic.version = 11 : i64} {
  func.func @encoder_kernel(%arg0: i32, %arg1: memref<8x32xbf16, #tpu.memory_space<vmem>>, %arg2: memref<32x128xbf16, #tpu.memory_space<vmem>>, %arg3: memref<1x128xf32, #tpu.memory_space<vmem>>, %arg4: memref<128x128xbf16, #tpu.memory_space<vmem>>, %arg5: memref<1x128xf32, #tpu.memory_space<vmem>>, %arg6: memref<8x128xf32, #tpu.memory_space<vmem>>) attributes {dimension_semantics = [#tpu.dimension_semantics<parallel>], iteration_bounds = array<i64: 2>, scalar_prefetch = 0 : i64, scratch_operands = 0 : i64, tpu.core_type = #tpu.core_type<tc>, window_params = [{transform_indices = @transform_0, window_bounds = array<i64: 8, 32>}, {pipeline_mode = #tpu.pipeline_mode<synchronous>, transform_indices = @transform_1, window_bounds = array<i64: 32, 128>}, {pipeline_mode = #tpu.pipeline_mode<synchronous>, transform_indices = @transform_2, window_bounds = array<i64: 1, 128>}, {pipeline_mode = #tpu.pipeline_mode<synchronous>, transform_indices = @transform_3, window_bounds = array<i64: 128, 128>}, {pipeline_mode = #tpu.pipeline_mode<synchronous>, transform_indices = @transform_4, window_bounds = array<i64: 1, 128>}, {transform_indices = @transform_5, window_bounds = array<i64: 8, 128>}]} {
    %c0 = arith.constant 0 : index
    %c0_0 = arith.constant 0 : index
    %0 = vector.load %arg1[%c0, %c0_0] : memref<8x32xbf16, #tpu.memory_space<vmem>>, vector<8x32xbf16>
    %c0_1 = arith.constant 0 : index
    %c0_2 = arith.constant 0 : index
    %1 = vector.load %arg2[%c0_1, %c0_2] : memref<32x128xbf16, #tpu.memory_space<vmem>>, vector<32x128xbf16>
    %cst = arith.constant dense<0.000000e+00> : vector<8x128xf32>
    %2 = tpu.matmul %0, %1, %cst {dimension_numbers = #tpu.dot_dimension_numbers<[1], [0], [0], [1], [0, 0, 1, 1], [], []>} : vector<8x32xbf16>, vector<32x128xbf16>, vector<8x128xf32> -> vector<8x128xf32>
    %c0_3 = arith.constant 0 : index
    %c0_4 = arith.constant 0 : index
    %3 = vector.load %arg3[%c0_3, %c0_4] : memref<1x128xf32, #tpu.memory_space<vmem>>, vector<1x128xf32>
    %4 = vector.broadcast %3 : vector<1x128xf32> to vector<8x128xf32>
    %5 = arith.addf %2, %4 : vector<8x128xf32>
    %cst_5 = arith.constant 0.000000e+00 : f32
    %6 = vector.broadcast %cst_5 : f32 to vector<8x128xf32>
    %7 = arith.maximumf %5, %6 : vector<8x128xf32>
    %8 = arith.truncf %7 : vector<8x128xf32> to vector<8x128xbf16>
    %c0_6 = arith.constant 0 : index
    %c0_7 = arith.constant 0 : index
    %9 = vector.load %arg4[%c0_6, %c0_7] : memref<128x128xbf16, #tpu.memory_space<vmem>>, vector<128x128xbf16>
    %cst_8 = arith.constant dense<0.000000e+00> : vector<8x128xf32>
    %10 = tpu.matmul %8, %9, %cst_8 {dimension_numbers = #tpu.dot_dimension_numbers<[1], [0], [0], [1], [0, 0, 1, 1], [], []>} : vector<8x128xbf16>, vector<128x128xbf16>, vector<8x128xf32> -> vector<8x128xf32>
    %c0_9 = arith.constant 0 : index
    %c0_10 = arith.constant 0 : index
    %11 = vector.load %arg5[%c0_9, %c0_10] : memref<1x128xf32, #tpu.memory_space<vmem>>, vector<1x128xf32>
    %12 = vector.broadcast %11 : vector<1x128xf32> to vector<8x128xf32>
    %13 = arith.addf %10, %12 : vector<8x128xf32>
    %c0_11 = arith.constant 0 : index
    %c0_12 = arith.constant 0 : index
    %14 = vector.load %arg6[%c0_11, %c0_12] : memref<8x128xf32, #tpu.memory_space<vmem>>, vector<8x128xf32>
    tpu.vector_store %arg6[%c0_11, %c0_12], %13 {strides = array<i32>} : memref<8x128xf32, #tpu.memory_space<vmem>>, vector<8x128xf32>,
    return
  }
  func.func @transform_0(%arg0: i32) -> (i32, i32) {
    %c0_i32 = arith.constant 0 : i32
    %c0_i32_0 = arith.constant 0 : i32
    return %arg0, %c0_i32 : i32, i32
  }
  func.func @transform_1(%arg0: i32) -> (i32, i32) {
    %c0_i32 = arith.constant 0 : i32
    %c0_i32_0 = arith.constant 0 : i32
    %c0_i32_1 = arith.constant 0 : i32
    return %c0_i32, %c0_i32_0 : i32, i32
  }
  func.func @transform_2(%arg0: i32) -> (i32, i32) {
    %c0_i32 = arith.constant 0 : i32
    %c0_i32_0 = arith.constant 0 : i32
    %c0_i32_1 = arith.constant 0 : i32
    return %c0_i32, %c0_i32_0 : i32, i32
  }
  func.func @transform_3(%arg0: i32) -> (i32, i32) {
    %c0_i32 = arith.constant 0 : i32
    %c0_i32_0 = arith.constant 0 : i32
    %c0_i32_1 = arith.constant 0 : i32
    return %c0_i32, %c0_i32_0 : i32, i32
  }
  func.func @transform_4(%arg0: i32) -> (i32, i32) {
    %c0_i32 = arith.constant 0 : i32
    %c0_i32_0 = arith.constant 0 : i32
    %c0_i32_1 = arith.constant 0 : i32
    return %c0_i32, %c0_i32_0 : i32, i32
  }
  func.func @transform_5(%arg0: i32) -> (i32, i32) {
    %c0_i32 = arith.constant 0 : i32
    %c0_i32_0 = arith.constant 0 : i32
    return %arg0, %c0_i32 : i32, i32
  }
}

</mosaic_0001>

<bundles_post_ra>
// kernel: tpu_custom_call.1
= control target key start
LH: loop header
LB: loop body
LE: loop exit
PB: predicated region body
PF: predicated region fallthrough
CT: control target
= control target key end

     0   :  { %10 = vsyncpa [#allocation3], 0  ;;  %s1137_s0 = inlined_call_operand.hbm [shape: bf16[16,32], index: 0, kind: input, shape index: {}]   ;;  %s1138_s1 = inlined_call_operand.hbm [shape: bf16[32,128], index: 1, kind: input, shape index: {}]   ;;  %s1139_s2 = inlined_call_operand.vmem [shape: f32[1,128], index: 2, kind: input, shape index: {}]   ;;  %s1140_s3 = inlined_call_operand.hbm [shape: bf16[128,128], index: 3, kind: input, shape index: {}]   ;;  %s1141_s4 = inlined_call_operand.vmem [shape: f32[1,128], index: 4, kind: input, shape index: {}]   ;;  %s1142_s5 = inlined_call_operand.hbm [shape: f32[16,128], index: 5, kind: output, shape index: {}]  }
   0x1   :  { %12 = vsyncpa [#allocation3 + $0x1], 0 }
   0x2   :  { %13 = vsyncpa [#allocation6], 0 }
   0x3   :  { %14 = vsyncpa [#allocation4], 0 }
   0x4   :  { %16 = vsyncpa [#allocation4 + $0x1], 0  ;;  %s901_s18 = smov 0   ;;  %s903_s19 = smov 0  }
   0x5   :  { %s905_s20 = smov 0   ;;  %s907_s21 = smov 0  }
   0x6 LB: > { %s922_s22 = sadd.s32 4294967295, %s861_s21   ;;  %s555_s23 = sadd.s32 4294967294, %s861_s21   ;;  %s861_s21 = sphi %s907_s21, %s1162_s21   ;;  %s857_s20 = sphi %s905_s20, %s1161_s20   ;;  %s853_s19 = sphi %s903_s19, %s1160_s19   ;;  %s849_s18 = sphi %s901_s18, %s1159_s18  }
   0x7   : > { %p42_p0 = scmp.ne.s32.totalorder %s853_s19, %s849_s18  ;;  %p1143_p1 = scmp.eq.s32.totalorder %s922_s22, 0 }
   0x8   : > { %p156_p3 = scmp.eq.s32.totalorder %s555_s23, 1  ;;  %p556_p5 = scmp.ge.s32.totalorder %s861_s21, 1 }
   0x9   : > { %p931_p4 = por %p1143_p1, %p42_p0  ;;  %p163_p7 = scmp.lt.s32.totalorder %s861_s21, 3 }
   0xa   : > { %p936_p6 = por %p156_p3, %p42_p0  ;;  %s863_s27 = smov [#allocation5]  }
   0xb   : > { %s1146_s24 = scalar_select %p931_p4, 1, 0 }
   0xc   : > { %s1147_s25 = scalar_select %p936_p6, 1, 0 }
   0xd   : > { %p941_p8 = pnand %p556_p5, %p163_p7  ;;  %s175_s28 = sshll.u32 %s863_s27, 4  ;;  %s945_s28 = int_to_ptr.vmem [resolvable:$true] %s175_s28 }
   0xe   : > { %s864_s30 = smov [#allocation7]   ;;  %s705_s9 = scalar_lea.hbm %s1138_s1, 256 }
   0xf   : > { %p636_p9 = pneg %p941_p8  ;;  %s191_s6 = sshll.u32 %s864_s30, 4  ;;  %s956_s6 = int_to_ptr.vmem [resolvable:$true] %s191_s6 }
  0x10   : > { %p706_p12 = scmp.ne.s32.totalorder %s1138_s1, %s705_s9  ;;  %p712_p5 = scmp.lt.u32.totalorder %s705_s9, %s1138_s1 }
  0x11   : > { %p952_p11 = pnand %p636_p9, %p1143_p1 }
  0x13   : > { %p707_p13 = pneg %p952_p11 }
  0x15   : > { %p708_p0 = pnand %p707_p13, %p706_p12 }
  0x17   : > { %p709_p3 = pneg %p708_p0 }
  0x19   : > { %p714_p7 = pnand %p712_p5, %p709_p3 }
  0x1b   : > { %717 = shalt.err (!%p714_p7)
}
  0x1c   : > { %s718_s14 = scalar_lea.vmem %s945_s28, 256  ;;  %p726_p2 = scmp.lt.s32.totalorder %s945_s28, %s945_s28 }
  0x1d   : > { %p719_p9 = scmp.ne.s32.totalorder %s945_s28, %s718_s14  ;;  %p727_p12 = scmp.lt.s32.totalorder %s718_s14, %s718_s14 }
  0x1f   : > { %p721_p10 = pnand %p719_p9, %p707_p13  ;;  %p728_p0 = por %p727_p12, %p726_p2 }
  0x21   : > { %p722_p1 = pneg %p721_p10 }
  0x23   : > { %p729_p6 = pnand %p728_p0, %p722_p1 }
  0x25   : > { %732 = shalt.err (!%p729_p6)
}
  0x26   : > { %s865_s15 = smov 64   ;;  %s866_s16 = smov 4  }
  0x27   : > { %639 = dma.hbm_to_vmem [thread:$0]  (!%p952_p11), %s1138_s1, 256, %s945_s28, [#allocation6], %s865_s15, %s865_s15, %s866_s16  }
  0x28   : > { %s733_s7 = scalar_lea.hbm %s1140_s3, 1024 }
  0x29   : > { %p734_p2 = scmp.ne.s32.totalorder %s1140_s3, %s733_s7  ;;  %p740_p10 = scmp.lt.u32.totalorder %s733_s7, %s1140_s3 }
  0x2b   : > { %p736_p1 = pnand %p734_p2, %p707_p13 }
  0x2d   : > { %p737_p6 = pneg %p736_p1 }
  0x2f   : > { %p742_p3 = pnand %p740_p10, %p737_p6 }
  0x31   : > { %745 = shalt.err (!%p742_p3)
}
  0x32   : > { %s746_s28 = scalar_lea.vmem %s956_s6, 1024  ;;  %p754_p12 = scmp.lt.s32.totalorder %s956_s6, %s956_s6 }
  0x33   : > { %p747_p5 = scmp.ne.s32.totalorder %s956_s6, %s746_s28  ;;  %p755_p0 = scmp.lt.s32.totalorder %s746_s28, %s746_s28 }
  0x35   : > { %p749_p7 = pnand %p747_p5, %p707_p13  ;;  %p756_p2 = por %p755_p0, %p754_p12 }
  0x37   : > { %p750_p9 = pneg %p749_p7 }
  0x39   : > { %p757_p1 = pnand %p756_p2, %p750_p9 }
  0x3b   : > { %760 = shalt.err (!%p757_p1)
}
  0x3c   : > { %642 = dma.hbm_to_vmem [thread:$0]  (!%p952_p11), %s1140_s3, 1024, %s956_s6, [#allocation6], %s865_s15, %s865_s15, %s866_s16  }
  0x3d   : > { %s1011_s14 = sadd.s32 1, %s861_s21   ;;  %s29_s29 = sadd.s32 1, %s857_s20 }
  0x3e   : > { %s26_s17 = ssub.s32 %s861_s21, %s1011_s14  ;;  %p36_p13 = scmp.ne.s32.totalorder %s857_s20, %s853_s19 }
  0x3f   : > { %p27_p6 = scmp.eq.s32.totalorder %s26_s17, 0  ;;  %p37_p10 = scmp.eq.s32.totalorder %s861_s21, 0 }
  0x40   : > { %p1150_p3 = scmp.eq.s32.totalorder %s922_s22, 1  ;;  %p653_p7 = scmp.lt.s32.totalorder %s861_s21, 2 }
  0x41   : > { %s1027_s27 = scalar_select %p27_p6, %s857_s20, %s29_s29  }
  0x42   : > { %p1021_p5 = por %p1150_p3, %p36_p13  ;;  %p38_p9 = por %p37_p10, %p36_p13 }
  0x43   : > { %s208_s30 = sand.u32 1, %s857_s20   ;;  %s561_s6 = sshll.u32 %s861_s21, 6 }
  0x44   : > { %s1151_s23 = scalar_select %p1021_p5, 1, 0 }
  0x45   : > { %s560_s7 = sshll.u32 %s208_s30, 2  ;;  %s1034_s8 = scalar_lea.hbm %s1137_s0, %s561_s6 }
  0x46   : > { %s212_s9 = scalar_lea.vmem [#allocation2], %s560_s7  ;;  %p1038_p11 = pnand %p653_p7, %p38_p9 }
  0x47   : > { %s219_s10 = sshll.u32 %s212_s9, 4  ;;  %s209_s28 = scalar_lea.sflag [#allocation3], %s208_s30  ;;  %s1036_s10 = int_to_ptr.vmem [resolvable:$true] %s219_s10 }
  0x48   : > { %s761_s12 = scalar_lea.hbm %s1034_s8, 64  ;;  %p763_p0 = pneg %p1038_p11 }
  0x49   : > { %p762_p12 = scmp.ne.s32.totalorder %s1034_s8, %s761_s12  ;;  %s766_s17 = scalar_lea.hbm %s1137_s0, 128 }
  0x4a   : > { %p767_p13 = scmp.lt.u32.totalorder %s1034_s8, %s1137_s0  ;;  %p768_p6 = scmp.lt.u32.totalorder %s766_s17, %s761_s12 }
  0x4b   : > { %p764_p2 = pnand %p763_p0, %p762_p12  ;;  %p770_p3 = scmp.lt.u32.totalorder %s761_s12, %s1034_s8 }
  0x4c   : > { %p769_p10 = por %p768_p6, %p767_p13 }
  0x4d   : > { %p765_p1 = pneg %p764_p2 }
  0x4e   : > { %p771_p7 = por %p770_p3, %p769_p10 }
  0x50   : > { %p772_p9 = pnand %p771_p7, %p765_p1 }
  0x52   : > { %775 = shalt.err (!%p772_p9)
}
  0x53   : > { %s776_s30 = scalar_lea.vmem %s1036_s10, 64  ;;  %s867_s15 = smov [#allocation2]  }
  0x54   : > { %p777_p12 = scmp.ne.s32.totalorder %s1036_s10, %s776_s30  ;;  %s781_s16 = sshll.u32 %s867_s15, 4  ;;  %s782_s16 = int_to_ptr.vmem [resolvable:$false] %s781_s16 }
  0x55   : > { %s783_s9 = scalar_lea.vmem %s782_s16, 128  ;;  %p784_p4 = scmp.lt.s32.totalorder %s1036_s10, %s782_s16 }
  0x56   : > { %p779_p2 = pnand %p777_p12, %p763_p0  ;;  %p785_p13 = scmp.lt.s32.totalorder %s783_s9, %s776_s30 }
  0x58   : > { %p780_p5 = pneg %p779_p2  ;;  %p786_p6 = por %p785_p13, %p784_p4 }
  0x5a   : > { %p787_p10 = pnand %p786_p6, %p780_p5 }
  0x5c   : > { %790 = shalt.err (!%p787_p10)
}
  0x5d   : > { %646 = dma.hbm_to_vmem [thread:$0]  (!%p1038_p11), %s1034_s8, 64, %s1036_s10, %s209_s28  }
  0x5e   : > { %228 = sbr.rel (%p941_p8) target bundleno = 561 (0x231), region = 40  ;;  %s1070_s12 = sand.u32 (!%p941_p8), 1, %s853_s19  }
  0x5f   : > { %s563_s13 = sshll.u32 (!%p941_p8), %s1070_s12, 2  ;;  %s231_s29 = scalar_lea.sflag (!%p941_p8), [#allocation3], %s1070_s12 }
  0x60   : > { %s234_s17 = scalar_lea.vmem (!%p941_p8), [#allocation2], %s563_s13  ;;  %p1153_p4 = scmp.ne.s32.totalorder (!%p941_p8), %s1146_s24, 0 }
  0x65   : > { %836 = dma.done.wait (%p1153_p4), %s231_s29, 64  }
  0x66   : > { %838 = vsyncadd (%p1153_p4), %s231_s29, 4294967232  ;;  %p1154_p5 = scmp.eq.s32.totalorder %s922_s22, 0 }
  0x68   : > { %840 = dma.done.wait (%p1154_p5), [#allocation6], 1280   ;;  %p1155_p11 = pmov %p1154_p5 }
  0x69   : > { %v868_v0 = vmov 0.0   ;;  %vm869_vm0 = vmmov 0   ;;  %v695_v1 = vld [vmem:[#allocation5] sm:$0xff]   ;;  %v696_v2 = vld [vmem:[#allocation5 + $0x8] sm:$0xff]   ;;  %v697_v3 = vld [vmem:[#allocation7] sm:$0xff]   ;;  %vm294_vm1 = vcmask 261120  }
  0x6a   : > { %842 = vsyncadd (%p1155_p11), [#allocation6], 4294966016  ;;  %596 = vmatprep.subr.bf16.mxu0 %v868_v0  ;;  %600 = vmatprep.mubr.msk.bf16.mxu0 %vm869_vm0, %v868_v0  ;;  %v698_v4 = vld [vmem:[#allocation7 + $0x8] sm:$0xff]   ;;  %v699_v6 = vld [vmem:[#allocation7 + $0x10] sm:$0xff]   ;;  %s566_s8 = sshll.u32 %s1070_s12, 3  ;;  %s581_s28 = sshll.u32 %s922_s22, 7 }
  0x6b   : > { %604 = vmatprep.subr.bf16.mxu1 %v868_v0  ;;  %620 = vmatprep.mubr.msk.bf16.mxu1 %vm869_vm0, %v868_v0  ;;  %v270_v5 = vld [vmem:[%s234_s17] sm:$0xf]  ;;  %v700_v7 = vld [vmem:[#allocation7 + $0x18] sm:$0xff]   ;;  %v701_v8 = vld [vmem:[#allocation7 + $0x20] sm:$0xff]   ;;  %s268_s7 = scalar_lea.vmem [#allocation8], %s566_s8  ;;  %s1093_s16 = scalar_lea.hbm %s1142_s5, %s581_s28 }
  0x6c   : > { %597 = vmatpush3.bf16.msra.mxu0 %v695_v1  ;;  %605 = vmatpush3.bf16.msra.mxu1 %v697_v3  ;;  %v702_v9 = vld [vmem:[#allocation7 + $0x28] sm:$0xff]   ;;  %v703_v10 = vld [vmem:[#allocation7 + $0x30] sm:$0xff]   ;;  %v704_v11 = vld [vmem:[#allocation7 + $0x38] sm:$0xff]   ;;  %s466_s6 = sshll.u32 %s268_s7, 4  ;;  %s453_s9 = scalar_lea.sflag [#allocation4], %s1070_s12  ;;  %s1095_s6 = int_to_ptr.vmem [resolvable:$true] %s466_s6 }
  0x6d   : > { %598 = vmatprep.subr.bf16.mxu0 %v868_v0  ;;  %606 = vmatprep.subr.bf16.mxu1 %v868_v0  ;;  %v567_v12 = vld [vmem:[%s1139_s2] ss:$0 sm:$0xff]  ;;  %s791_s22 = scalar_lea.vmem %s1095_s6, 128  ;;  %p1156_p0 = scmp.ne.s32.totalorder %s1151_s23, 0 }
  0x6e   : > { %v571_v20 = vld [vmem:[%s1141_s4] ss:$0 sm:$0xff]  ;;  %p792_p8 = scmp.ne.s32.totalorder %s1095_s6, %s791_s22  ;;  %s870_s13 = smov [#allocation8]  }
  0x6f   : > { %s795_s29 = sshll.u32 %s870_s13, 4  ;;  %s796_s29 = int_to_ptr.vmem [resolvable:$false] %s795_s29 }
  0x70   : > { %599 = vmatpush3.bf16.msra.mxu0 %v696_v2  ;;  %607 = vmatpush3.bf16.msra.mxu1 %v698_v4  ;;  %p793_p1 = pnand %p792_p8, %p1156_p0  ;;  %s797_s17 = scalar_lea.vmem %s796_s29, 256 }
  0x71   : > { %608 = vmatprep.subr.bf16.mxu1 %v868_v0  ;;  %p798_p7 = scmp.lt.s32.totalorder %s1095_s6, %s796_s29  ;;  %p799_p9 = scmp.lt.s32.totalorder %s797_s17, %s791_s22 }
  0x72   : > { %p794_p3 = pneg %p793_p1 }
  0x73   : > { %601 = vmatmul.mubr.msk.bf16.vlgmr.msra.gmra.mrb[0].mxu0 %vm294_vm1, %v270_v5  ;;  %p800_p12 = por %p799_p9, %p798_p7 }
  0x74   : > { %609 = vmatpush3.bf16.msra.mxu1 %v699_v6 }
  0x75   : > { %610 = vmatprep.subr.bf16.mxu1 %v868_v0  ;;  %p801_p2 = pnand %p800_p12, %p794_p3 }
  0x78   : > { %611 = vmatpush3.bf16.msra.mxu1 %v700_v7 }
  0x79   : > { %612 = vmatprep.subr.bf16.mxu1 %v868_v0 }
  0x7c   : > { %613 = vmatpush3.bf16.msra.mxu1 %v701_v8 }
  0x7d   : > { %614 = vmatprep.subr.bf16.mxu1 %v868_v0 }
  0x80   : > { %615 = vmatpush3.bf16.msra.mxu1 %v702_v9 }
  0x81   : > { %616 = vmatprep.subr.bf16.mxu1 %v868_v0 }
  0x84   : > { %617 = vmatpush3.bf16.msra.mxu1 %v703_v10 }
  0x85   : > { %618 = vmatprep.subr.bf16.mxu1 %v868_v0 }
  0x88   : > { %619 = vmatpush3.bf16.msra.mxu1 %v704_v11 }
 0x146   : > { %v332_v13 = vpop.f32.mrb[0].mxu0 }
 0x147   : > { %v333_v14 = vadd.f32 %v567_v12, %v332_v13  ;;  %v602_v15 = vpop.f32.mrb[1].mxu0 }
 0x148   : > { %v335_v16 = vpop.f32.mrb[2].mxu0 }
 0x149   : > { %v338_v17 = vmax.f32 %v333_v14, 0.0  ;;  %v603_v18 = vpop.f32.mrb[3].mxu0 }
 0x14b   : > { %v339_v19 = vpack.c.bf16 %v338_v17, %v338_v17 }
 0x14d   : > { %621 = vmatmul.mubr.bf16.vlgmr.msra.gmra.mrb[0].mxu1 %v339_v19 }
 0x220   : > { %v445_v21 = vpop.f32.mrb[0].mxu1 }
 0x221   : > { %v446_v22 = vadd.f32 %v571_v20, %v445_v21  ;;  %v622_v23 = vpop.f32.mrb[1].mxu1 }
 0x222   : > { %v448_v24 = vpop.f32.mrb[2].mxu1 }
 0x223   : > { %451 = vst [vmem:[%s268_s7] sm:$0xff] %v446_v22  ;;  %v623_v25 = vpop.f32.mrb[3].mxu1 }
 0x224   : > { %804 = shalt.err (!%p801_p2)
}
 0x225   : > { %s805_s12 = scalar_lea.hbm %s1093_s16, 128  ;;  %s809_s8 = scalar_lea.hbm %s1142_s5, 256 }
 0x226   : > { %p806_p13 = scmp.ne.s32.totalorder %s1093_s16, %s805_s12  ;;  %p810_p4 = scmp.lt.u32.totalorder %s1093_s16, %s1142_s5 }
 0x227   : > { %p811_p5 = scmp.lt.u32.totalorder %s809_s8, %s805_s12  ;;  %p813_p8 = scmp.lt.u32.totalorder %s805_s12, %s1093_s16 }
 0x228   : > { %p807_p6 = pnand %p806_p13, %p1156_p0 }
 0x229   : > { %p812_p11 = por %p811_p5, %p810_p4 }
 0x22a   : > { %p808_p10 = pneg %p807_p6 }
 0x22b   : > { %p814_p1 = por %p813_p8, %p812_p11 }
 0x22d   : > { %p815_p3 = pnand %p814_p1, %p808_p10 }
 0x22f   : > { %818 = shalt.err (!%p815_p3)
}
 0x230   : > { %634 = dma.vmem_to_hbm [thread:$0]  (%p1156_p0), %s1095_s6, 128, %s1093_s16, %s453_s9  }
 0x231 PF: > { %s478_s28 = sand.u32 1, %s849_s18   ;;  %p1157_p7 = scmp.ne.s32.totalorder %s1147_s25, 0 }
 0x232   : > { %p1158_p9 = scmp.ge.s32.totalorder %s861_s21, 2  ;;  %s479_s7 = scalar_lea.sflag [#allocation4], %s478_s28 }
 0x234   : > { %p648_p12 = pnand %p1158_p9, %p1157_p7 }
 0x236   : > { %844 = dma.done.wait (!%p648_p12), %s479_s7, 128  }
 0x237   : > { %846 = vsyncadd (!%p648_p12), %s479_s7, 4294967168  ;;  %p19_p2 = scmp.ge.s32.totalorder %s1011_s14, 4   ;;  %s1159_s18 = smov %s853_s19 }
 0x238   : > { %s1160_s19 = smov %s857_s20  ;;  %s1161_s20 = smov %s1027_s27 }
 0x239   : > { %s1162_s21 = smov %s1011_s14  ;;  %21 = sbr.rel (!%p19_p2) target bundleno = 6 (0x6), region = 93 }
 0x240   :  { %484 = vsyncpa [#allocation3], 1 }
 0x241   :  { %486 = vsyncpa [#allocation3 + $0x1], 1 }
 0x242   :  { %487 = vsyncpa [#allocation6], 1 }
 0x243   :  { %488 = vsyncpa [#allocation4], 1 }
 0x244   :  { %490 = vsyncpa [#allocation4 + $0x1], 1 }

</bundles_post_ra>
